<compile_context>
chip_gen: v7x
topology: tpu7x:2x2x1
jax: 0.10.0
libtpu: 0.0.40
codegen_flags: <defaults>
</compile_context>

<pallas_src>
import jax
import jax.numpy as jnp
from jax import lax
from jax.experimental import pallas as pl
from jax.experimental.pallas import tpu as pltpu

KSIZE = 9  # conv kernel size (9x9, stride 1, no padding)


def _round_up(x, m):
    return ((x + m - 1) // m) * m


def _conv_mm_kernel(p_ref, w_ref, b_ref, o_ref, acc_ref):
    # One (tm, tn) output tile, reduced over the K grid axis.
    k = pl.program_id(2)

    @pl.when(k == 0)
    def _():
        acc_ref[...] = jnp.zeros_like(acc_ref)

    acc_ref[...] += jnp.dot(
        p_ref[...], w_ref[...], preferred_element_type=jnp.float32)

    @pl.when(k == pl.num_programs(2) - 1)
    def _():
        acc = acc_ref[...] + b_ref[...]            # bias broadcast over rows (f32)
        o_ref[...] = jnp.maximum(acc, 0.0).astype(o_ref.dtype)


def _im2col_bf16(x, oh, ow):
    # x: (B, Cin, H, W) -> patches: (B*OH*OW, Cin*81) in bf16,
    # ordered (cin, kh, kw) to match PyTorch weight.reshape(Cout, Cin*KH*KW).
    x = x.astype(jnp.bfloat16)
    cols = jnp.stack(
        [x[:, :, kh:kh + oh, kw:kw + ow] for kh in range(KSIZE) for kw in range(KSIZE)],
        axis=2,
    )                                              # (B, Cin, 81, OH, OW)
    cols = jnp.transpose(cols, (0, 3, 4, 1, 2))    # (B, OH, OW, Cin, 81)
    b, _, _, cin, kk = cols.shape
    return cols.reshape(b * oh * ow, cin * kk)


@jax.jit
def convolution_layer(x, weight, bias):
    """Forward of ConvolutionLayer: relu(conv2d(x, weight, bias)).

    x:      (B, Cin, H, W)        float32  (NCHW)
    weight: (Cout, Cin, 9, 9)     float32  (PyTorch OIHW)
    bias:   (Cout,)               float32
    returns (B, Cout, OH, OW)     float32
    """
    B, Cin, H, W = x.shape
    Cout = weight.shape[0]
    OH, OW = H - KSIZE + 1, W - KSIZE + 1

    # ---- glue: im2col (bf16) + padding to MXU-friendly shapes ----
    patches = _im2col_bf16(x, OH, OW)                          # (M, K) bf16
    M, K = patches.shape
    N = Cout
    w2 = weight.reshape(Cout, K).T.astype(jnp.bfloat16)        # (K, N) bf16

    # Tile sizes (static, derived from shapes): large M tile to amortize
    # per-grid-step overhead, lane-dense N tile, bounded K tile.
    tm = min(512, _round_up(M, 128))
    tn = 256 if N >= 256 else 128
    tk = min(1024, _round_up(K, 128))

    Mp = _round_up(M, tm)
    Np = _round_up(N, tn)
    Kp = _round_up(K, tk)

    patches_p = jnp.pad(patches, ((0, Mp - M), (0, Kp - K)))
    w2_p = jnp.pad(w2, ((0, Kp - K), (0, Np - N)))
    bias_p = jnp.pad(bias.astype(jnp.float32), (0, Np - N)).reshape(1, Np)

    # Explicit VMEM budget: double-buffered bf16 A/B + f32 out + accumulator.
    vmem_bytes = (2 * (tm * tk + tk * tn) * 2      # A, B (bf16), 2-deep
                  + 2 * 1 * tn * 4                 # bias (f32), 2-deep
                  + 2 * tm * tn * 4                # output (f32), 2-deep
                  + tm * tn * 4)                   # accumulator scratch (f32)
    vmem_limit = min(max(vmem_bytes + (4 << 20), 16 << 20), 96 << 20)

    cost = pl.CostEstimate(
        flops=2 * M * K * N,
        transcendentals=0,
        bytes_accessed=M * K * 2 + K * N * 2 + M * N * 4,
    )

    # ---- Pallas GEMM + bias + ReLU ----
    out_p = pl.pallas_call(
        _conv_mm_kernel,
        out_shape=jax.ShapeDtypeStruct((Mp, Np), jnp.float32),
        grid_spec=pltpu.PrefetchScalarGridSpec(
            num_scalar_prefetch=0,
            grid=(Mp // tm, Np // tn, Kp // tk),
            in_specs=[
                pl.BlockSpec((tm, tk), lambda i, j, k: (i, k)),
                pl.BlockSpec((tk, tn), lambda i, j, k: (k, j)),
                pl.BlockSpec((1, tn), lambda i, j, k: (0, j)),
            ],
            out_specs=pl.BlockSpec((tm, tn), lambda i, j, k: (i, j)),
            scratch_shapes=[pltpu.VMEM((tm, tn), jnp.float32)],
        ),
        compiler_params=pltpu.CompilerParams(
            dimension_semantics=("parallel", "parallel", "arbitrary"),
            vmem_limit_bytes=vmem_limit,
        ),
        cost_estimate=cost,
    )(patches_p, w2_p, bias_p)

    out = out_p[:M, :N]                                        # (B*OH*OW, Cout)
    out = out.reshape(B, OH, OW, Cout)
    return jnp.transpose(out, (0, 3, 1, 2))                    # NCHW


def _reference(x, weight, bias):
    y = lax.conv_general_dilated(
        x, weight, window_strides=(1, 1), padding="VALID",
        dimension_numbers=("NCHW", "OIHW", "NCHW"))
    return jnp.maximum(y + bias[None, :, None, None], 0.0)


if __name__ == "__main__":
    # Small shapes consistent with the module's forward (default in_channels=1;
    # out_channels shrunk from 256 to 32 to keep the example small).
    B, Cin, H, W = 2, 1, 16, 16
    Cout = 32

    key = jax.random.PRNGKey(0)
    kx, kw, kb = jax.random.split(key, 3)
    x = jax.random.normal(kx, (B, Cin, H, W), jnp.float32)

    # Deterministic parameter init (kaiming-uniform-like bounds, as nn.Conv2d).
    fan_in = Cin * KSIZE * KSIZE
    bound = 1.0 / jnp.sqrt(fan_in)
    weight = jax.random.uniform(kw, (Cout, Cin, KSIZE, KSIZE), jnp.float32,
                                minval=-bound, maxval=bound)
    bias = jax.random.uniform(kb, (Cout,), jnp.float32,
                              minval=-bound, maxval=bound)

    y = convolution_layer(x, weight, bias)
    y = jax.block_until_ready(y)

    y_ref = _reference(x, weight, bias)
    assert y.shape == (B, Cout, H - 8, W - 8), y.shape
    # bf16 operands, f32 accumulation -> loose tolerance vs f32 reference.
    assert jnp.allclose(y, y_ref, rtol=2e-2, atol=2e-2), "mismatch vs reference conv"

    print("KERNEL_OK")
</pallas_src>

<mosaic_0001>
module attributes {stable_mosaic.version = 11 : i64} {
  func.func @_conv_mm_kernel(%arg0: i32, %arg1: i32, %arg2: i32, %arg3: memref<128x128xbf16, #tpu.memory_space<vmem>>, %arg4: memref<128x128xbf16, #tpu.memory_space<vmem>>, %arg5: memref<1x128xf32, #tpu.memory_space<vmem>>, %arg6: memref<128x128xf32, #tpu.memory_space<vmem>>, %arg7: memref<128x128xf32, #tpu.memory_space<vmem>>) attributes {dimension_semantics = [#tpu.dimension_semantics<parallel>, #tpu.dimension_semantics<parallel>, #tpu.dimension_semantics<arbitrary>], iteration_bounds = array<i64: 1, 1, 1>, scalar_prefetch = 0 : i64, scratch_operands = 1 : i64, tpu.core_type = #tpu.core_type<tc>, window_params = [{transform_indices = @transform_0, window_bounds = array<i64: 128, 128>}, {transform_indices = @transform_1, window_bounds = array<i64: 128, 128>}, {transform_indices = @transform_2, window_bounds = array<i64: 1, 128>}, {transform_indices = @transform_3, window_bounds = array<i64: 128, 128>}]} {
    %c0_i32 = arith.constant 0 : i32
    %0 = arith.cmpi eq, %arg2, %c0_i32 : i32
    %1 = arith.extui %0 : i1 to i32
    %c0_i32_0 = arith.constant 0 : i32
    %2 = arith.cmpi ne, %1, %c0_i32_0 : i32
    scf.if %2 {
      %cst_10 = arith.constant 0.000000e+00 : f32
      %12 = vector.broadcast %cst_10 : f32 to vector<128x128xf32>
      %c0_11 = arith.constant 0 : index
      %c0_12 = arith.constant 0 : index
      %13 = vector.load %arg7[%c0_11, %c0_12] : memref<128x128xf32, #tpu.memory_space<vmem>>, vector<128x128xf32>
      tpu.vector_store %arg7[%c0_11, %c0_12], %12 {strides = array<i32>} : memref<128x128xf32, #tpu.memory_space<vmem>>, vector<128x128xf32>,
    } else {
    }
    %c0 = arith.constant 0 : index
    %c0_1 = arith.constant 0 : index
    %3 = vector.load %arg7[%c0, %c0_1] : memref<128x128xf32, #tpu.memory_space<vmem>>, vector<128x128xf32>
    %c0_2 = arith.constant 0 : index
    %c0_3 = arith.constant 0 : index
    %4 = vector.load %arg3[%c0_2, %c0_3] : memref<128x128xbf16, #tpu.memory_space<vmem>>, vector<128x128xbf16>
    %c0_4 = arith.constant 0 : index
    %c0_5 = arith.constant 0 : index
    %5 = vector.load %arg4[%c0_4, %c0_5] : memref<128x128xbf16, #tpu.memory_space<vmem>>, vector<128x128xbf16>
    %cst = arith.constant dense<0.000000e+00> : vector<128x128xf32>
    %6 = tpu.matmul %4, %5, %cst {dimension_numbers = #tpu.dot_dimension_numbers<[1], [0], [0], [1], [0, 0, 1, 1], [], []>} : vector<128x128xbf16>, vector<128x128xbf16>, vector<128x128xf32> -> vector<128x128xf32>
    %7 = arith.addf %3, %6 : vector<128x128xf32>
    %c0_6 = arith.constant 0 : index
    %c0_7 = arith.constant 0 : index
    %8 = vector.load %arg7[%c0_6, %c0_7] : memref<128x128xf32, #tpu.memory_space<vmem>>, vector<128x128xf32>
    tpu.vector_store %arg7[%c0_6, %c0_7], %7 {strides = array<i32>} : memref<128x128xf32, #tpu.memory_space<vmem>>, vector<128x128xf32>,
    %c0_i32_8 = arith.constant 0 : i32
    %9 = arith.cmpi eq, %arg2, %c0_i32_8 : i32
    %10 = arith.extui %9 : i1 to i32
    %c0_i32_9 = arith.constant 0 : i32
    %11 = arith.cmpi ne, %10, %c0_i32_9 : i32
    scf.if %11 {
      %c0_10 = arith.constant 0 : index
      %c0_11 = arith.constant 0 : index
      %12 = vector.load %arg7[%c0_10, %c0_11] : memref<128x128xf32, #tpu.memory_space<vmem>>, vector<128x128xf32>
      %c0_12 = arith.constant 0 : index
      %c0_13 = arith.constant 0 : index
      %13 = vector.load %arg5[%c0_12, %c0_13] : memref<1x128xf32, #tpu.memory_space<vmem>>, vector<1x128xf32>
      %14 = vector.broadcast %13 : vector<1x128xf32> to vector<128x128xf32>
      %15 = arith.addf %12, %14 : vector<128x128xf32>
      %cst_14 = arith.constant 0.000000e+00 : f32
      %16 = vector.broadcast %cst_14 : f32 to vector<128x128xf32>
      %17 = arith.maximumf %15, %16 : vector<128x128xf32>
      %c0_15 = arith.constant 0 : index
      %c0_16 = arith.constant 0 : index
      %18 = vector.load %arg6[%c0_15, %c0_16] : memref<128x128xf32, #tpu.memory_space<vmem>>, vector<128x128xf32>
      tpu.vector_store %arg6[%c0_15, %c0_16], %17 {strides = array<i32>} : memref<128x128xf32, #tpu.memory_space<vmem>>, vector<128x128xf32>,
    } else {
    }
    return
  }
  func.func @transform_0(%arg0: i32, %arg1: i32, %arg2: i32) -> (i32, i32) {
    %c0_i32 = arith.constant 0 : i32
    return %arg0, %arg2 : i32, i32
  }
  func.func @transform_1(%arg0: i32, %arg1: i32, %arg2: i32) -> (i32, i32) {
    %c0_i32 = arith.constant 0 : i32
    return %arg2, %arg1 : i32, i32
  }
  func.func @transform_2(%arg0: i32, %arg1: i32, %arg2: i32) -> (i32, i32) {
    %c0_i32 = arith.constant 0 : i32
    %c0_i32_0 = arith.constant 0 : i32
    return %c0_i32, %arg1 : i32, i32
  }
  func.func @transform_3(%arg0: i32, %arg1: i32, %arg2: i32) -> (i32, i32) {
    %c0_i32 = arith.constant 0 : i32
    return %arg0, %arg1 : i32, i32
  }
}

</mosaic_0001>

<bundles_post_ra>
// kernel: convolution_layer.1
= control target key start
LH: loop header
LB: loop body
LE: loop exit
PB: predicated region body
PF: predicated region fallthrough
CT: control target
= control target key end

     0   :  { %s609_s0 = inlined_call_operand.vmem [shape: bf16[128,128], index: 0, kind: input, shape index: {}]   ;;  %s610_s1 = inlined_call_operand.vmem [shape: bf16[128,128], index: 1, kind: input, shape index: {}]   ;;  %s611_s2 = inlined_call_operand.vmem [shape: f32[1,128], index: 2, kind: input, shape index: {}]   ;;  %s612_s3 = inlined_call_operand.hbm [shape: f32[128,128], index: 3, kind: output, shape index: {}]  }
   0x1   :  { %v483_v0 = vld [vmem:[%s610_s1] sm:$0xff]   ;;  %v484_v1 = vld [vmem:[%s610_s1 + $0x8] sm:$0xff]   ;;  %v485_v2 = vld [vmem:[%s610_s1 + $0x10] sm:$0xff]  }
   0x2   :  { %432 = vmatprep.subr.bf16.mxu0 %v483_v0  ;;  %464 = vmatprep.subr.bf16.mxu1 %v483_v0  ;;  %v486_v3 = vld [vmem:[%s610_s1 + $0x18] sm:$0xff]   ;;  %v491_v4 = vld [vmem:[%s609_s0] sm:$0xff]   ;;  %v488_v7 = vld [vmem:[%s610_s1 + $0x28] sm:$0xff]  }
   0x3   :  { %433 = vmatpush3.bf16.msra.mxu0 %v483_v0  ;;  %472 = vmatpush3.bf16.msra.mxu1 %v483_v0  ;;  %v492_v5 = vld [vmem:[%s609_s0 + $0x20] sm:$0xff]  }
   0x4   :  { %434 = vmatprep.subr.bf16.mxu0 %v484_v1  ;;  %465 = vmatprep.subr.bf16.mxu1 %v484_v1  ;;  %v487_v6 = vld [vmem:[%s610_s1 + $0x20] sm:$0xff]  }
   0x5   :  { %448 = vmatprep.mubr.bf16.mxu0 %v491_v4  ;;  %456 = vmatprep.mubr.bf16.mxu1 %v492_v5 }
   0x7   :  { %435 = vmatpush3.bf16.msra.mxu0 %v484_v1  ;;  %473 = vmatpush3.bf16.msra.mxu1 %v484_v1 }
   0x8   :  { %436 = vmatprep.subr.bf16.mxu0 %v485_v2  ;;  %466 = vmatprep.subr.bf16.mxu1 %v485_v2 }
   0xb   :  { %437 = vmatpush3.bf16.msra.mxu0 %v485_v2  ;;  %474 = vmatpush3.bf16.msra.mxu1 %v485_v2 }
   0xc   :  { %438 = vmatprep.subr.bf16.mxu0 %v486_v3  ;;  %467 = vmatprep.subr.bf16.mxu1 %v486_v3 }
   0xf   :  { %439 = vmatpush3.bf16.msra.mxu0 %v486_v3  ;;  %475 = vmatpush3.bf16.msra.mxu1 %v486_v3 }
  0x10   :  { %440 = vmatprep.subr.bf16.mxu0 %v487_v6  ;;  %468 = vmatprep.subr.bf16.mxu1 %v487_v6 }
  0x11   :  { %8 = vsyncpa [#allocation4], 0  ;;  %v489_v8 = vld [vmem:[%s610_s1 + $0x30] sm:$0xff]   ;;  %v490_v9 = vld [vmem:[%s610_s1 + $0x38] sm:$0xff]  }
  0x12   :  { %v493_v10 = vld [vmem:[%s609_s0 + $0x8] sm:$0xff]   ;;  %v495_v12 = vld [vmem:[%s609_s0 + $0x10] sm:$0xff]   ;;  %v497_v14 = vld [vmem:[%s609_s0 + $0x18] sm:$0xff]  }
  0x13   :  { %441 = vmatpush3.bf16.msra.mxu0 %v487_v6  ;;  %476 = vmatpush3.bf16.msra.mxu1 %v487_v6  ;;  %v494_v11 = vld [vmem:[%s609_s0 + $0x28] sm:$0xff]   ;;  %v496_v13 = vld [vmem:[%s609_s0 + $0x30] sm:$0xff]   ;;  %v498_v15 = vld [vmem:[%s609_s0 + $0x38] sm:$0xff]   ;;  %s523_s0 = smov [#allocation3]  }
  0x14   :  { %442 = vmatprep.subr.bf16.mxu0 %v488_v7  ;;  %469 = vmatprep.subr.bf16.mxu1 %v488_v7  ;;  %v415_v16 = vld [vmem:[%s611_s2] ss:$0 sm:$0xff]  ;;  %s388_s2 = sshll.u32 %s523_s0, 4  ;;  %s389_s2 = int_to_ptr.vmem [resolvable:$true] %s388_s2 }
  0x15   :  { %s499_s18 = scalar_lea.vmem %s389_s2, 2048  ;;  %p504_p1 = scmp.lt.s32.totalorder %s389_s2, %s389_s2 }
  0x16   :  { %p500_p0 = scmp.ne.s32.totalorder %s389_s2, %s499_s18  ;;  %p505_p2 = scmp.lt.s32.totalorder %s499_s18, %s499_s18 }
  0x17   :  { %443 = vmatpush3.bf16.msra.mxu0 %v488_v7  ;;  %477 = vmatpush3.bf16.msra.mxu1 %v488_v7 }
  0x18   :  { %444 = vmatprep.subr.bf16.mxu0 %v489_v8  ;;  %470 = vmatprep.subr.bf16.mxu1 %v489_v8  ;;  %p506_p3 = por %p505_p2, %p504_p1 }
  0x1a   :  { %p507_p4 = pnand %p506_p3, %p500_p0 }
  0x1b   :  { %445 = vmatpush3.bf16.msra.mxu0 %v489_v8  ;;  %478 = vmatpush3.bf16.msra.mxu1 %v489_v8 }
  0x1c   :  { %446 = vmatprep.subr.bf16.mxu0 %v490_v9  ;;  %471 = vmatprep.subr.bf16.mxu1 %v490_v9 }
  0x1f   :  { %447 = vmatpush3.bf16.msra.mxu0 %v490_v9  ;;  %479 = vmatpush3.bf16.msra.mxu1 %v490_v9 }
  0x22   :  { %449 = vmatmul.mubr.bf16.vlgmr.msra.gmra.mrb[0].mxu0 %v493_v10  ;;  %457 = vmatmul.mubr.bf16.vlgmr.msra.gmra.mrb[0].mxu1 %v494_v11 }
  0x23   :  { %452 = vmatprep.mubr.bf16.mxu0 %v495_v12  ;;  %460 = vmatprep.mubr.bf16.mxu1 %v496_v13 }
  0x2a   :  { %453 = vmatmul.mubr.bf16.gmra.mrb[4].mxu0 %v497_v14  ;;  %461 = vmatmul.mubr.bf16.gmra.mrb[4].mxu1 %v498_v15 }
  0xf5   :  { %v450_v17 = vpop.f32.mrb[0].mxu0  ;;  %v458_v18 = vpop.f32.mrb[0].mxu1 }
  0xf6   :  { %v337_v19 = vadd.f32 %v450_v17, %v415_v16  ;;  %v345_v20 = vadd.f32 %v458_v18, %v415_v16  ;;  %v214_v21 = vpop.f32.mrb[1].mxu0  ;;  %v246_v22 = vpop.f32.mrb[1].mxu1 }
  0xf7   :  { %v335_v23 = vadd.f32 %v415_v16, %v214_v21  ;;  %v343_v24 = vadd.f32 %v415_v16, %v246_v22  ;;  %v451_v25 = vpop.f32.mrb[2].mxu0  ;;  %v459_v26 = vpop.f32.mrb[2].mxu1 }
  0xf8   :  { %v353_v27 = vmax.f32 %v337_v19, 0.0  ;;  %v361_v28 = vmax.f32 %v345_v20, 0.0  ;;  %v338_v29 = vadd.f32 %v451_v25, %v415_v16  ;;  %v346_v30 = vadd.f32 %v459_v26, %v415_v16  ;;  %v217_v31 = vpop.f32.mrb[3].mxu0  ;;  %v249_v32 = vpop.f32.mrb[3].mxu1 }
  0xf9   :  { %v351_v33 = vmax.f32 %v335_v23, 0.0  ;;  %v359_v34 = vmax.f32 %v343_v24, 0.0  ;;  %v336_v35 = vadd.f32 %v415_v16, %v217_v31  ;;  %v344_v36 = vadd.f32 %v415_v16, %v249_v32 }
  0xfa   :  { %369 = vst [vmem:[#allocation3 + $0x10] sm:$0xff] %v353_v27  ;;  %377 = vst [vmem:[#allocation3 + $0x50] sm:$0xff] %v361_v28  ;;  %v354_v37 = vmax.f32 %v338_v29, 0.0  ;;  %v362_v38 = vmax.f32 %v346_v30, 0.0 }
  0xfb   :  { %367 = vst [vmem:[#allocation3] sm:$0xff] %v351_v33  ;;  %375 = vst [vmem:[#allocation3 + $0x40] sm:$0xff] %v359_v34  ;;  %v352_v39 = vmax.f32 %v336_v35, 0.0  ;;  %v360_v40 = vmax.f32 %v344_v36, 0.0 }
  0xfc   :  { %370 = vst [vmem:[#allocation3 + $0x18] sm:$0xff] %v354_v37  ;;  %378 = vst [vmem:[#allocation3 + $0x58] sm:$0xff] %v362_v38 }
  0xfd   :  { %368 = vst [vmem:[#allocation3 + $0x8] sm:$0xff] %v352_v39  ;;  %376 = vst [vmem:[#allocation3 + $0x48] sm:$0xff] %v360_v40  ;;  %v454_v41 = vpop.f32.mrb[4].mxu0  ;;  %v462_v42 = vpop.f32.mrb[4].mxu1 }
  0xfe   :  { %v341_v43 = vadd.f32 %v454_v41, %v415_v16  ;;  %v349_v44 = vadd.f32 %v462_v42, %v415_v16  ;;  %v230_v45 = vpop.f32.mrb[5].mxu0  ;;  %v262_v46 = vpop.f32.mrb[5].mxu1 }
  0xff   :  { %v339_v47 = vadd.f32 %v415_v16, %v230_v45  ;;  %v347_v48 = vadd.f32 %v415_v16, %v262_v46  ;;  %v455_v49 = vpop.f32.mrb[6].mxu0  ;;  %v463_v50 = vpop.f32.mrb[6].mxu1 }
 0x100   :  { %v357_v51 = vmax.f32 %v341_v43, 0.0  ;;  %v365_v52 = vmax.f32 %v349_v44, 0.0  ;;  %v342_v53 = vadd.f32 %v455_v49, %v415_v16  ;;  %v350_v54 = vadd.f32 %v463_v50, %v415_v16  ;;  %v233_v55 = vpop.f32.mrb[7].mxu0  ;;  %v265_v56 = vpop.f32.mrb[7].mxu1 }
 0x101   :  { %v355_v57 = vmax.f32 %v339_v47, 0.0  ;;  %v363_v58 = vmax.f32 %v347_v48, 0.0  ;;  %v340_v59 = vadd.f32 %v415_v16, %v233_v55  ;;  %v348_v60 = vadd.f32 %v415_v16, %v265_v56 }
 0x102   :  { %373 = vst [vmem:[#allocation3 + $0x30] sm:$0xff] %v357_v51  ;;  %381 = vst [vmem:[#allocation3 + $0x70] sm:$0xff] %v365_v52  ;;  %v358_v61 = vmax.f32 %v342_v53, 0.0  ;;  %v366_v62 = vmax.f32 %v350_v54, 0.0 }
 0x103   :  { %371 = vst [vmem:[#allocation3 + $0x20] sm:$0xff] %v355_v57  ;;  %379 = vst [vmem:[#allocation3 + $0x60] sm:$0xff] %v363_v58  ;;  %v356_v63 = vmax.f32 %v340_v59, 0.0  ;;  %v364_v0 = vmax.f32 %v348_v60, 0.0 }
 0x104   :  { %374 = vst [vmem:[#allocation3 + $0x38] sm:$0xff] %v358_v61  ;;  %382 = vst [vmem:[#allocation3 + $0x78] sm:$0xff] %v366_v62 }
 0x105   :  { %372 = vst [vmem:[#allocation3 + $0x28] sm:$0xff] %v356_v63  ;;  %380 = vst [vmem:[#allocation3 + $0x68] sm:$0xff] %v364_v0 }
 0x106   :  { %510 = shalt.err (!%p507_p4)
}
 0x107   :  { %s511_s21 = scalar_lea.hbm %s612_s3, 2048 }
 0x108   :  { %p512_p5 = scmp.ne.s32.totalorder %s612_s3, %s511_s21  ;;  %p515_p6 = scmp.lt.u32.totalorder %s511_s21, %s612_s3 }
 0x10a   :  { %p517_p7 = pnand %p515_p6, %p512_p5 }
 0x10c   :  { %520 = shalt.err (!%p517_p7)
}
 0x10d   :  { %s524_s26 = smov 128   ;;  %s525_s27 = smov 8  }
 0x10e   :  { %394 = dma.vmem_to_hbm [thread:$0]  %s389_s2, 2048, %s612_s3, [#allocation4], %s524_s26, %s524_s26, %s525_s27  }
 0x10f   :  { %521 = dma.done.wait [#allocation4], 2048  }
 0x110   :  { %522 = vsyncadd [#allocation4], 4294965248 }
 0x111   :  { %398 = vsyncpa [#allocation4], 1 }

</bundles_post_ra>
